<compile_context>
chip_gen: v5e
topology: v5e:2x2
jax: 0.10.0
libtpu: 0.0.40
codegen_flags: <defaults>
</compile_context>

<pallas_src>
import functools

import jax
import jax.numpy as jnp
from jax.experimental import pallas as pl
from jax.experimental.pallas import tpu as pltpu

LANE = 128
EPS = 1e-5


# ----------------------------------------------------------------------------- kernel
def _make_densenet_kernel(num_hidden: int, batch_norm: bool, use_softmax: bool,
                          out_features: int, eps: float = EPS):
    """Fused MLP kernel: one VMEM-resident block of `req_tile` full request batches."""
    rows_per_hidden = 3 if batch_norm else 1

    def kernel(x_ref, w_ref, v_ref, o_ref):
        x3 = x_ref[...]                              # [req_tile, batch, 128] f32
        rt, bsz, _ = x3.shape
        inv_b = 1.0 / float(bsz)
        x = x3.reshape(rt * bsz, LANE)               # flatten requests onto sublanes

        row = 0
        for i in range(num_hidden):
            w = w_ref[i]                             # [128, 128] f32 (static index)
            b = v_ref[pl.ds(row, 1), :]              # [1, 128] f32
            # Linear on the MXU (f32 in, f32 accumulate) + bias, then ReLU.
            y = jnp.dot(x, w, preferred_element_type=jnp.float32) + b
            y = jnp.maximum(y, 0.0)

            if batch_norm:
                gamma = v_ref[pl.ds(row + 1, 1), :]  # [1, 128]
                beta = v_ref[pl.ds(row + 2, 1), :]   # [1, 128]
                # Training-mode BatchNorm1d, statistics PER REQUEST, single pass:
                #   var = E[y^2] - E[y]^2 ; fold into one affine y*scale + shift.
                y3 = y.reshape(rt, bsz, LANE)
                s1 = jnp.sum(y3, axis=1, keepdims=True)           # [rt, 1, 128]
                s2 = jnp.sum(y3 * y3, axis=1, keepdims=True)      # [rt, 1, 128]
                mean = s1 * inv_b
                var = jnp.maximum(s2 * inv_b - mean * mean, 0.0)
                scale = gamma * jax.lax.rsqrt(var + eps)          # EUP rsqrt
                shift = beta - mean * scale
                y = ((y3 * scale) + shift).reshape(rt * bsz, LANE)

            x = y
            row += rows_per_hidden

        # Output linear.
        w = w_ref[num_hidden]
        b = v_ref[pl.ds(row, 1), :]
        x = jnp.dot(x, w, preferred_element_type=jnp.float32) + b

        if use_softmax:
            # Mask zero-padded lanes so softmax only sees the real logits.
            col = jax.lax.broadcasted_iota(jnp.int32, x.shape, 1)
            x = jnp.where(col < out_features, x, -1e30)
            x = x - jnp.max(x, axis=-1, keepdims=True)
            e = jnp.exp(x)
            denom = jnp.sum(e, axis=-1, keepdims=True)
            x = e * pl.reciprocal(denom, approx=False)   # exact: rows sum to 1

        o_ref[...] = x.reshape(rt, bsz, LANE).astype(o_ref.dtype)

    return kernel


# ------------------------------------------------------------------- one-time packing
def _pad_lanes(a, width=LANE, value=0.0):
    pad = width - a.shape[-1]
    if pad <= 0:
        return a
    cfg = [(0, 0)] * (a.ndim - 1) + [(0, pad)]
    return jnp.pad(a, cfg, constant_values=value)


def pack_params(hidden_params, out_params, batch_norm):
    """Run ONCE per parameter set (not per forward call).

    Zero-pads every feature dim to 128 lanes, stacks all layer weights into one
    [L, 128, 128] f32 tensor and all small per-layer vectors (bias[, gamma, beta],
    out-bias) into one [rows, 128] f32 tensor -> 3 input DMAs total at call time.
    """
    w_list, v_rows = [], []
    for p in hidden_params:
        w, b = p[0], p[1]
        w_pad = jnp.zeros((LANE, LANE), jnp.float32).at[: w.shape[0], : w.shape[1]].set(w)
        w_list.append(w_pad)
        v_rows.append(_pad_lanes(b.reshape(1, -1)))
        if batch_norm:
            gamma, beta = p[2], p[3]
            v_rows.append(_pad_lanes(gamma.reshape(1, -1)))
            v_rows.append(_pad_lanes(beta.reshape(1, -1)))
    w_out, b_out = out_params
    w_pad = jnp.zeros((LANE, LANE), jnp.float32).at[: w_out.shape[0], : w_out.shape[1]].set(w_out)
    w_list.append(w_pad)
    v_rows.append(_pad_lanes(b_out.reshape(1, -1)))

    w_stack = jnp.stack(w_list).astype(jnp.float32)              # [L, 128, 128]
    vecs = jnp.concatenate(v_rows, axis=0).astype(jnp.float32)   # [rows, 128]
    return jax.device_put(w_stack), jax.device_put(vecs)


# ------------------------------------------------------------------------ jitted call
@functools.partial(
    jax.jit,
    static_argnames=("num_hidden", "batch_norm", "use_softmax", "out_features",
                     "req_tile"))
def densenet_forward(x, w_stack, vecs, *, num_hidden, batch_norm, use_softmax,
                     out_features, req_tile=1):
    """x: [batch, in] (single request) or [num_requests, batch, in].
    w_stack / vecs: pre-packed tensors from pack_params()."""
    single = (x.ndim == 2)
    if single:
        x = x[None]
    num_requests, batch, _ = x.shape
    if num_requests % req_tile != 0:
        raise ValueError("num_requests must be divisible by req_tile")

    x_pad = _pad_lanes(x.astype(jnp.float32))        # [R, batch, 128]

    kernel = _make_densenet_kernel(num_hidden, batch_norm, use_softmax, out_features)

    num_layers = num_hidden + 1
    cost = pl.CostEstimate(
        flops=2 * num_requests * batch * LANE * LANE * num_layers,
        transcendentals=num_requests * batch * LANE + num_requests * num_hidden * LANE,
        bytes_accessed=(x_pad.size * 4 + w_stack.size * 4 + vecs.size * 4
                        + num_requests * batch * LANE * 4),
    )

    blk = (req_tile, batch, LANE)
    out_padded = pl.pallas_call(
        kernel,
        out_shape=jax.ShapeDtypeStruct((num_requests, batch, LANE), jnp.float32),
        grid=(num_requests // req_tile,),
        in_specs=[pl.BlockSpec(blk, lambda r: (r, 0, 0)),
                  pl.BlockSpec(w_stack.shape, lambda r: (0, 0, 0)),
                  pl.BlockSpec(vecs.shape, lambda r: (0, 0))],
        out_specs=pl.BlockSpec(blk, lambda r: (r, 0, 0)),
        compiler_params=pltpu.CompilerParams(
            dimension_semantics=("parallel",),     # v7x: shard requests over both TCs
            vmem_limit_bytes=4 * 1024 * 1024,      # resident footprint ~0.5 MiB
        ),
        cost_estimate=cost,
    )(x_pad, w_stack, vecs)

    out = out_padded[..., :out_features]            # fuses inside this jit
    return out[0] if single else out


# -------------------------------------------------------------------- init & reference
def _init_params(layers, key, batch_norm):
    """Deterministic init matching PyTorch defaults + _bias0: weights ~ U(+/-1/sqrt(fan_in)),
    biases = 0, BN gamma = 1, beta = 0."""
    hidden_params = []
    for s1, s2 in zip(layers[:-2], layers[1:-1]):
        key, kw = jax.random.split(key)
        bound = 1.0 / (s1 ** 0.5)
        w = jax.random.uniform(kw, (s1, s2), jnp.float32, -bound, bound)
        b = jnp.zeros((1, s2), jnp.float32)
        if batch_norm:
            gamma = jnp.ones((1, s2), jnp.float32)
            beta = jnp.zeros((1, s2), jnp.float32)
            hidden_params.append((w, b, gamma, beta))
        else:
            hidden_params.append((w, b))
    s1, s2 = layers[-2], layers[-1]
    key, kw = jax.random.split(key)
    bound = 1.0 / (s1 ** 0.5)
    w_out = jax.random.uniform(kw, (s1, s2), jnp.float32, -bound, bound)
    b_out = jnp.zeros((1, s2), jnp.float32)
    return hidden_params, (w_out, b_out)


def _reference_forward(x, hidden_params, out_params, *, batch_norm, use_softmax, eps=EPS):
    """Plain-JAX reference with PyTorch module semantics (f32, per-request BN)."""
    def one(h):
        for p in hidden_params:
            w, b = p[0], p[1]
            h = h @ w + b
            h = jnp.maximum(h, 0.0)
            if batch_norm:
                gamma, beta = p[2], p[3]
                mean = jnp.mean(h, axis=0, keepdims=True)
                var = jnp.mean((h - mean) ** 2, axis=0, keepdims=True)
                h = gamma * (h - mean) * jax.lax.rsqrt(var + eps) + beta
        w, b = out_params
        h = h @ w + b
        if use_softmax:
            h = jax.nn.softmax(h, axis=-1)
        return h

    if x.ndim == 2:
        return one(x)
    return jnp.stack([one(x[r]) for r in range(x.shape[0])])


# --------------------------------------------------------------------------------- main
if __name__ == "__main__":
    # DenseNet(layers=[16, 32, 32, 8], activation=ReLU, batch_norm=True, use_softmax=True)
    layers = [16, 32, 32, 8]
    batch = 8
    num_requests = 4     # independent forwards batched together
    req_tile = 2         # requests per grid step -> M = 16 rows per MXU matmul
    batch_norm = True
    use_softmax = True

    key = jax.random.PRNGKey(0)
    key, kx = jax.random.split(key)
    x = jax.random.normal(kx, (num_requests, batch, layers[0]), jnp.float32)

    hidden_params, out_params = _init_params(layers, key, batch_norm)

    # Pack parameters ONCE (hoisted out of the per-call path).
    w_stack, vecs = pack_params(hidden_params, out_params, batch_norm)

    # Multi-request path: grid over request groups, parallel semantics.
    out = densenet_forward(x, w_stack, vecs,
                           num_hidden=len(hidden_params),
                           batch_norm=batch_norm, use_softmax=use_softmax,
                           out_features=layers[-1], req_tile=req_tile)
    jax.block_until_ready(out)

    ref = _reference_forward(x, hidden_params, out_params,
                             batch_norm=batch_norm, use_softmax=use_softmax)
    assert out.shape == (num_requests, batch, layers[-1])
    assert jnp.allclose(out, ref, atol=2e-3, rtol=2e-3)
    if use_softmax:
        assert jnp.allclose(jnp.sum(out, axis=-1), 1.0, atol=1e-4)

    # Single-request (2-D input) path, same packed params, no re-packing.
    out1 = densenet_forward(x[0], w_stack, vecs,
                            num_hidden=len(hidden_params),
                            batch_norm=batch_norm, use_softmax=use_softmax,
                            out_features=layers[-1], req_tile=1)
    jax.block_until_ready(out1)
    assert out1.shape == (batch, layers[-1])
    assert jnp.allclose(out1, ref[0], atol=2e-3, rtol=2e-3)

    print("KERNEL_OK")
</pallas_src>

<mosaic_0001>
module attributes {stable_mosaic.version = 11 : i64} {
  func.func @kernel(%arg0: i32, %arg1: memref<2x8x128xf32, #tpu.memory_space<vmem>>, %arg2: memref<3x128x128xf32, #tpu.memory_space<vmem>>, %arg3: memref<7x128xf32, #tpu.memory_space<vmem>>, %arg4: memref<2x8x128xf32, #tpu.memory_space<vmem>>) attributes {dimension_semantics = [#tpu.dimension_semantics<parallel>], iteration_bounds = array<i64: 2>, scalar_prefetch = 0 : i64, scratch_operands = 0 : i64, tpu.core_type = #tpu.core_type<tc>, window_params = [{transform_indices = @transform_0, window_bounds = array<i64: 2, 8, 128>}, {pipeline_mode = #tpu.pipeline_mode<synchronous>, transform_indices = @transform_1, window_bounds = array<i64: 3, 128, 128>}, {pipeline_mode = #tpu.pipeline_mode<synchronous>, transform_indices = @transform_2, window_bounds = array<i64: 7, 128>}, {transform_indices = @transform_3, window_bounds = array<i64: 2, 8, 128>}]} {
    %c0 = arith.constant 0 : index
    %c0_0 = arith.constant 0 : index
    %c0_1 = arith.constant 0 : index
    %0 = vector.load %arg1[%c0, %c0_0, %c0_1] : memref<2x8x128xf32, #tpu.memory_space<vmem>>, vector<2x8x128xf32>
    %1 = vector.shape_cast %0 : vector<2x8x128xf32> to vector<16x128xf32>
    %c0_2 = arith.constant 0 : index
    %c0_3 = arith.constant 0 : index
    %c0_4 = arith.constant 0 : index
    %2 = vector.load %arg2[%c0_2, %c0_3, %c0_4] : memref<3x128x128xf32, #tpu.memory_space<vmem>>, vector<1x128x128xf32>
    %3 = vector.shape_cast %2 : vector<1x128x128xf32> to vector<128x128xf32>
    %c0_5 = arith.constant 0 : index
    %c0_6 = arith.constant 0 : index
    %4 = vector.load %arg3[%c0_5, %c0_6] : memref<7x128xf32, #tpu.memory_space<vmem>>, vector<1x128xf32>
    %cst = arith.constant dense<0.000000e+00> : vector<16x128xf32>
    %5 = tpu.matmul %1, %3, %cst {dimension_numbers = #tpu.dot_dimension_numbers<[1], [0], [0], [1], [0, 0, 1, 1], [], []>} : vector<16x128xf32>, vector<128x128xf32>, vector<16x128xf32> -> vector<16x128xf32>
    %6 = vector.broadcast %4 : vector<1x128xf32> to vector<16x128xf32>
    %7 = arith.addf %5, %6 : vector<16x128xf32>
    %cst_7 = arith.constant 0.000000e+00 : f32
    %8 = vector.broadcast %cst_7 : f32 to vector<16x128xf32>
    %9 = arith.maximumf %7, %8 : vector<16x128xf32>
    %c1 = arith.constant 1 : index
    %c0_8 = arith.constant 0 : index
    %10 = vector.load %arg3[%c1, %c0_8] : memref<7x128xf32, #tpu.memory_space<vmem>>, vector<1x128xf32>
    %c2 = arith.constant 2 : index
    %c0_9 = arith.constant 0 : index
    %11 = vector.load %arg3[%c2, %c0_9] : memref<7x128xf32, #tpu.memory_space<vmem>>, vector<1x128xf32>
    %12 = vector.shape_cast %9 : vector<16x128xf32> to vector<2x8x128xf32>
    %cst_10 = arith.constant dense<0.000000e+00> : vector<2x128xf32>
    %13 = vector.multi_reduction <add>, %12, %cst_10 [1] : vector<2x8x128xf32> to vector<2x128xf32>
    %14 = vector.shape_cast %13 : vector<2x128xf32> to vector<2x1x128xf32>
    %15 = arith.mulf %12, %12 : vector<2x8x128xf32>
    %cst_11 = arith.constant dense<0.000000e+00> : vector<2x128xf32>
    %16 = vector.multi_reduction <add>, %15, %cst_11 [1] : vector<2x8x128xf32> to vector<2x128xf32>
    %17 = vector.shape_cast %16 : vector<2x128xf32> to vector<2x1x128xf32>
    %cst_12 = arith.constant 1.250000e-01 : f32
    %18 = vector.broadcast %cst_12 : f32 to vector<2x1x128xf32>
    %19 = arith.mulf %14, %18 : vector<2x1x128xf32>
    %cst_13 = arith.constant 1.250000e-01 : f32
    %20 = vector.broadcast %cst_13 : f32 to vector<2x1x128xf32>
    %21 = arith.mulf %17, %20 : vector<2x1x128xf32>
    %22 = arith.mulf %19, %19 : vector<2x1x128xf32>
    %23 = arith.subf %21, %22 : vector<2x1x128xf32>
    %cst_14 = arith.constant 0.000000e+00 : f32
    %24 = vector.broadcast %cst_14 : f32 to vector<2x1x128xf32>
    %25 = arith.maximumf %23, %24 : vector<2x1x128xf32>
    %cst_15 = arith.constant 9.99999974E-6 : f32
    %26 = vector.broadcast %cst_15 : f32 to vector<2x1x128xf32>
    %27 = arith.addf %25, %26 : vector<2x1x128xf32>
    %28 = math.rsqrt %27 : vector<2x1x128xf32>
    %29 = vector.shape_cast %10 : vector<1x128xf32> to vector<1x1x128xf32>
    %30 = vector.broadcast %29 : vector<1x1x128xf32> to vector<2x1x128xf32>
    %31 = arith.mulf %30, %28 : vector<2x1x128xf32>
    %32 = arith.mulf %19, %31 : vector<2x1x128xf32>
    %33 = vector.shape_cast %11 : vector<1x128xf32> to vector<1x1x128xf32>
    %34 = vector.broadcast %33 : vector<1x1x128xf32> to vector<2x1x128xf32>
    %35 = arith.subf %34, %32 : vector<2x1x128xf32>
    %36 = vector.broadcast %31 : vector<2x1x128xf32> to vector<2x8x128xf32>
    %37 = arith.mulf %12, %36 : vector<2x8x128xf32>
    %38 = vector.broadcast %35 : vector<2x1x128xf32> to vector<2x8x128xf32>
    %39 = arith.addf %37, %38 : vector<2x8x128xf32>
    %40 = vector.shape_cast %39 : vector<2x8x128xf32> to vector<16x128xf32>
    %c1_16 = arith.constant 1 : index
    %c0_17 = arith.constant 0 : index
    %c0_18 = arith.constant 0 : index
    %41 = vector.load %arg2[%c1_16, %c0_17, %c0_18] : memref<3x128x128xf32, #tpu.memory_space<vmem>>, vector<1x128x128xf32>
    %42 = vector.shape_cast %41 : vector<1x128x128xf32> to vector<128x128xf32>
    %c3 = arith.constant 3 : index
    %c0_19 = arith.constant 0 : index
    %43 = vector.load %arg3[%c3, %c0_19] : memref<7x128xf32, #tpu.memory_space<vmem>>, vector<1x128xf32>
    %cst_20 = arith.constant dense<0.000000e+00> : vector<16x128xf32>
    %44 = tpu.matmul %40, %42, %cst_20 {dimension_numbers = #tpu.dot_dimension_numbers<[1], [0], [0], [1], [0, 0, 1, 1], [], []>} : vector<16x128xf32>, vector<128x128xf32>, vector<16x128xf32> -> vector<16x128xf32>
    %45 = vector.broadcast %43 : vector<1x128xf32> to vector<16x128xf32>
    %46 = arith.addf %44, %45 : vector<16x128xf32>
    %cst_21 = arith.constant 0.000000e+00 : f32
    %47 = vector.broadcast %cst_21 : f32 to vector<16x128xf32>
    %48 = arith.maximumf %46, %47 : vector<16x128xf32>
    %c4 = arith.constant 4 : index
    %c0_22 = arith.constant 0 : index
    %49 = vector.load %arg3[%c4, %c0_22] : memref<7x128xf32, #tpu.memory_space<vmem>>, vector<1x128xf32>
    %c5 = arith.constant 5 : index
    %c0_23 = arith.constant 0 : index
    %50 = vector.load %arg3[%c5, %c0_23] : memref<7x128xf32, #tpu.memory_space<vmem>>, vector<1x128xf32>
    %51 = vector.shape_cast %48 : vector<16x128xf32> to vector<2x8x128xf32>
    %cst_24 = arith.constant dense<0.000000e+00> : vector<2x128xf32>
    %52 = vector.multi_reduction <add>, %51, %cst_24 [1] : vector<2x8x128xf32> to vector<2x128xf32>
    %53 = vector.shape_cast %52 : vector<2x128xf32> to vector<2x1x128xf32>
    %54 = arith.mulf %51, %51 : vector<2x8x128xf32>
    %cst_25 = arith.constant dense<0.000000e+00> : vector<2x128xf32>
    %55 = vector.multi_reduction <add>, %54, %cst_25 [1] : vector<2x8x128xf32> to vector<2x128xf32>
    %56 = vector.shape_cast %55 : vector<2x128xf32> to vector<2x1x128xf32>
    %cst_26 = arith.constant 1.250000e-01 : f32
    %57 = vector.broadcast %cst_26 : f32 to vector<2x1x128xf32>
    %58 = arith.mulf %53, %57 : vector<2x1x128xf32>
    %cst_27 = arith.constant 1.250000e-01 : f32
    %59 = vector.broadcast %cst_27 : f32 to vector<2x1x128xf32>
    %60 = arith.mulf %56, %59 : vector<2x1x128xf32>
    %61 = arith.mulf %58, %58 : vector<2x1x128xf32>
    %62 = arith.subf %60, %61 : vector<2x1x128xf32>
    %cst_28 = arith.constant 0.000000e+00 : f32
    %63 = vector.broadcast %cst_28 : f32 to vector<2x1x128xf32>
    %64 = arith.maximumf %62, %63 : vector<2x1x128xf32>
    %cst_29 = arith.constant 9.99999974E-6 : f32
    %65 = vector.broadcast %cst_29 : f32 to vector<2x1x128xf32>
    %66 = arith.addf %64, %65 : vector<2x1x128xf32>
    %67 = math.rsqrt %66 : vector<2x1x128xf32>
    %68 = vector.shape_cast %49 : vector<1x128xf32> to vector<1x1x128xf32>
    %69 = vector.broadcast %68 : vector<1x1x128xf32> to vector<2x1x128xf32>
    %70 = arith.mulf %69, %67 : vector<2x1x128xf32>
    %71 = arith.mulf %58, %70 : vector<2x1x128xf32>
    %72 = vector.shape_cast %50 : vector<1x128xf32> to vector<1x1x128xf32>
    %73 = vector.broadcast %72 : vector<1x1x128xf32> to vector<2x1x128xf32>
    %74 = arith.subf %73, %71 : vector<2x1x128xf32>
    %75 = vector.broadcast %70 : vector<2x1x128xf32> to vector<2x8x128xf32>
    %76 = arith.mulf %51, %75 : vector<2x8x128xf32>
    %77 = vector.broadcast %74 : vector<2x1x128xf32> to vector<2x8x128xf32>
    %78 = arith.addf %76, %77 : vector<2x8x128xf32>
    %79 = vector.shape_cast %78 : vector<2x8x128xf32> to vector<16x128xf32>
    %c2_30 = arith.constant 2 : index
    %c0_31 = arith.constant 0 : index
    %c0_32 = arith.constant 0 : index
    %80 = vector.load %arg2[%c2_30, %c0_31, %c0_32] : memref<3x128x128xf32, #tpu.memory_space<vmem>>, vector<1x128x128xf32>
    %81 = vector.shape_cast %80 : vector<1x128x128xf32> to vector<128x128xf32>
    %c6 = arith.constant 6 : index
    %c0_33 = arith.constant 0 : index
    %82 = vector.load %arg3[%c6, %c0_33] : memref<7x128xf32, #tpu.memory_space<vmem>>, vector<1x128xf32>
    %cst_34 = arith.constant dense<0.000000e+00> : vector<16x128xf32>
    %83 = tpu.matmul %79, %81, %cst_34 {dimension_numbers = #tpu.dot_dimension_numbers<[1], [0], [0], [1], [0, 0, 1, 1], [], []>} : vector<16x128xf32>, vector<128x128xf32>, vector<16x128xf32> -> vector<16x128xf32>
    %84 = vector.broadcast %82 : vector<1x128xf32> to vector<16x128xf32>
    %85 = arith.addf %83, %84 : vector<16x128xf32>
    %86 = tpu.iota {dimensions = array<i32: 1>} : vector<16x128xi32>
    %c8_i32 = arith.constant 8 : i32
    %87 = vector.broadcast %c8_i32 : i32 to vector<16x128xi32>
    %88 = arith.cmpi slt, %86, %87 : vector<16x128xi32>
    %cst_35 = arith.constant -1.000000e+30 : f32
    %89 = vector.broadcast %cst_35 : f32 to vector<16x128xf32>
    %90 = arith.select %88, %85, %89 : vector<16x128xi1>, vector<16x128xf32>
    %cst_36 = arith.constant dense<0xFF800000> : vector<16xf32>
    %91 = vector.multi_reduction <maximumf>, %90, %cst_36 [1] : vector<16x128xf32> to vector<16xf32>
    %92 = vector.shape_cast %91 : vector<16xf32> to vector<16x1xf32>
    %93 = vector.broadcast %92 : vector<16x1xf32> to vector<16x128xf32>
    %94 = arith.subf %90, %93 : vector<16x128xf32>
    %95 = math.exp %94 : vector<16x128xf32>
    %cst_37 = arith.constant dense<0.000000e+00> : vector<16xf32>
    %96 = vector.multi_reduction <add>, %95, %cst_37 [1] : vector<16x128xf32> to vector<16xf32>
    %97 = vector.shape_cast %96 : vector<16xf32> to vector<16x1xf32>
    %98 = tpu.reciprocal %97 : vector<16x1xf32> -> vector<16x1xf32>
    %99 = vector.broadcast %98 : vector<16x1xf32> to vector<16x128xf32>
    %100 = arith.mulf %95, %99 : vector<16x128xf32>
    %101 = vector.shape_cast %100 : vector<16x128xf32> to vector<2x8x128xf32>
    %c0_38 = arith.constant 0 : index
    %c0_39 = arith.constant 0 : index
    %c0_40 = arith.constant 0 : index
    %102 = vector.load %arg4[%c0_38, %c0_39, %c0_40] : memref<2x8x128xf32, #tpu.memory_space<vmem>>, vector<2x8x128xf32>
    tpu.vector_store %arg4[%c0_38, %c0_39, %c0_40], %101 {strides = array<i32>} : memref<2x8x128xf32, #tpu.memory_space<vmem>>, vector<2x8x128xf32>,
    return
  }
  func.func @transform_0(%arg0: i32) -> (i32, i32, i32) {
    %c0_i32 = arith.constant 0 : i32
    %c0_i32_0 = arith.constant 0 : i32
    %c0_i32_1 = arith.constant 0 : i32
    return %arg0, %c0_i32, %c0_i32_0 : i32, i32, i32
  }
  func.func @transform_1(%arg0: i32) -> (i32, i32, i32) {
    %c0_i32 = arith.constant 0 : i32
    %c0_i32_0 = arith.constant 0 : i32
    %c0_i32_1 = arith.constant 0 : i32
    %c0_i32_2 = arith.constant 0 : i32
    return %c0_i32, %c0_i32_0, %c0_i32_1 : i32, i32, i32
  }
  func.func @transform_2(%arg0: i32) -> (i32, i32) {
    %c0_i32 = arith.constant 0 : i32
    %c0_i32_0 = arith.constant 0 : i32
    %c0_i32_1 = arith.constant 0 : i32
    return %c0_i32, %c0_i32_0 : i32, i32
  }
  func.func @transform_3(%arg0: i32) -> (i32, i32, i32) {
    %c0_i32 = arith.constant 0 : i32
    %c0_i32_0 = arith.constant 0 : i32
    %c0_i32_1 = arith.constant 0 : i32
    return %arg0, %c0_i32, %c0_i32_0 : i32, i32, i32
  }
}

</mosaic_0001>

<bundles_post_ra>
// kernel: densenet_forward.1
= control target key start
LH: loop header
LB: loop body
LE: loop exit
PB: predicated region body
PF: predicated region fallthrough
CT: control target
= control target key end

     0   :  { %8 = vsyncpa [#allocation3], 0  ;;  %s983_s0 = inlined_call_operand.vmem [shape: f32[4,8,128], index: 0, kind: input, shape index: {}]   ;;  %s984_s1 = inlined_call_operand.hbm [shape: f32[3,128,128], index: 1, kind: input, shape index: {}]   ;;  %s985_s2 = inlined_call_operand.vmem [shape: f32[7,128], index: 2, kind: input, shape index: {}]   ;;  %s986_s3 = inlined_call_operand.hbm [shape: f32[4,8,128], index: 3, kind: output, shape index: {}]  }
   0x1   :  { %9 = vsyncpa [#allocation4], 0 }
   0x2   :  { %11 = vsyncpa [#allocation4 + $0x1], 0  ;;  %s836_s12 = smov 0   ;;  %s838_s13 = smov 0  }
   0x3   :  { %s840_s14 = smov 0   ;;  %s842_s15 = smov 0  }
   0x4 LB: > { %s857_s16 = sadd.s32 4294967295, %s809_s15   ;;  %s609_s17 = sadd.s32 4294967294, %s809_s15   ;;  %s809_s15 = sphi %s842_s15, %s992_s15   ;;  %s805_s14 = sphi %s840_s14, %s991_s14   ;;  %s801_s13 = sphi %s838_s13, %s990_s13   ;;  %s797_s12 = sphi %s836_s12, %s989_s12  }
   0x5   : > { %s861_s18 = sadd.s32 1, %s809_s15   ;;  %s92_s19 = sadd.s32 1, %s805_s14 }
   0x6   : > { %s89_s20 = ssub.s32 %s809_s15, %s861_s18  ;;  %p102_p0 = scmp.ne.s32.totalorder %s805_s14, %s801_s13 }
   0x7   : > { %p90_p1 = scmp.eq.s32.totalorder %s89_s20, 0  ;;  %p103_p2 = scmp.eq.s32.totalorder %s857_s16, 1 }
   0x8   : > { %p108_p3 = scmp.ne.s32.totalorder %s801_s13, %s797_s12  ;;  %p109_p4 = scmp.eq.s32.totalorder %s609_s17, 1 }
   0x9   : > { %s872_s21 = scalar_select %p90_p1, %s805_s14, %s92_s19  }
   0xa   : > { %p874_p5 = por %p103_p2, %p102_p0  ;;  %p878_p6 = por %p109_p4, %p108_p3 }
   0xb   : > { %p610_p7 = scmp.ge.s32.totalorder %s809_s15, 1  ;;  %p116_p8 = scmp.lt.s32.totalorder %s809_s15, 3 }
   0xc   : > { %p654_p9 = scmp.eq.s32.totalorder %s857_s16, 0  ;;  %s127_s26 = sshll.u32 %s984_s1, 4  ;;  %s128_s26 = int_to_ptr.hbm [resolvable:$true] %s127_s26 }
   0xd   : > { %p117_p10 = pnand %p610_p7, %p116_p8  ;;  %s811_s27 = smov [#allocation2]  }
   0xe   : > { %s129_s28 = sshll.u32 %s811_s27, 4  ;;  %s812_s29 = smov 128   ;;  %s130_s28 = int_to_ptr.vmem [resolvable:$true] %s129_s28 }
   0xf   : > { %p646_p11 = pneg %p117_p10  ;;  %s813_s30 = smov 8  }
  0x10   : > { %157 = sbr.rel (%p117_p10) target bundleno = 823 (0x337), region = 32 }
  0x11   : > { %p647_p12 = pnand %p654_p9, %p646_p11 }
  0x13   : > { %649 = dma.hbm_to_vmem [thread:$0]  (!%p647_p12), %s128_s26, 6144, %s130_s28, [#allocation3], %s812_s29, %s812_s29, %s813_s30  }
  0x15   : > { %788 = dma.done.wait (%p654_p9), [#allocation3], 6144  }
  0x16   : > { %790 = vsyncadd (%p654_p9), [#allocation3], 4294961152  ;;  %v206_v0 = vld [vmem:[#allocation2 + $0x78] sm:$0xff]  ;;  %v205_v1 = vld [vmem:[#allocation2 + $0x70] sm:$0xff]  ;;  %s616_s4 = sshll.u32 %s857_s16, 1  ;;  %s623_s7 = sshll.u32 %s857_s16, 4 }
  0x17   : > { %209 = vmatpush.msra.mxu0 %v206_v0  ;;  %624 = vmatpush.msra.mxu3 %v206_v0  ;;  %v204_v2 = vld [vmem:[#allocation2 + $0x68] sm:$0xff]  ;;  %v203_v3 = vld [vmem:[#allocation2 + $0x60] sm:$0xff]  ;;  %v202_v4 = vld [vmem:[#allocation2 + $0x58] sm:$0xff]  ;;  %p183_p13 = scmp.lt.s32.totalorder %s616_s4, 3  ;;  %s531_s10 = scalar_lea.hbm %s986_s3, %s623_s7 }
  0x18   : > { %v201_v5 = vld [vmem:[#allocation2 + $0x50] sm:$0xff]  ;;  %v200_v6 = vld [vmem:[#allocation2 + $0x48] sm:$0xff]  ;;  %v199_v7 = vld [vmem:[#allocation2 + $0x40] sm:$0xff]  ;;  %s534_s19 = sshll.u32 %s531_s10, 4  ;;  %s763_s27 = scalar_lea.hbm %s986_s3, 32  ;;  %s535_s19 = int_to_ptr.hbm [resolvable:$true] %s534_s19 }
  0x19   : > { %210 = vmatpush.msra.mxu0 %v205_v1  ;;  %625 = vmatpush.msra.mxu3 %v205_v1  ;;  %v198_v8 = vld [vmem:[#allocation2 + $0x38] sm:$0xff]  ;;  %v197_v9 = vld [vmem:[#allocation2 + $0x30] sm:$0xff]  ;;  %v196_v10 = vld [vmem:[#allocation2 + $0x28] sm:$0xff]  ;;  %s994_s4 = smov (!%p183_p13, %s616_s4), 3  ;;  %s757_s20 = sshra.s32 %s535_s19, 4  ;;  %s758_s20 = int_to_ptr.hbm [resolvable:$true] %s757_s20 }
  0x1a   : > { %v195_v11 = vld [vmem:[#allocation2 + $0x20] sm:$0xff]  ;;  %v194_v12 = vld [vmem:[#allocation2 + $0x18] sm:$0xff]  ;;  %s617_s5 = sshll.u32 %s994_s4, 3  ;;  %v193_v13 = vld [vmem:[#allocation2 + $0x10] sm:$0xff]  ;;  %s759_s24 = scalar_lea.hbm %s758_s20, 16 }
  0x1b   : > { %211 = vmatpush.msra.mxu0 %v204_v2  ;;  %626 = vmatpush.msra.mxu3 %v204_v2  ;;  %v192_v14 = vld [vmem:[#allocation2 + $0x8] sm:$0xff]  ;;  %s186_s8 = scalar_lea.vmem %s983_s0, %s617_s5  ;;  %v191_v15 = vld [vmem:[#allocation2] sm:$0xff]  ;;  %v324_v18 = vld [vmem:[#allocation2 + $0xf8] sm:$0xff]  ;;  %s179_s5 = sand.u32 1, %s801_s13  }
  0x1c   : > { %v189_v16 = vld [vmem:[%s186_s8] sm:$0xff]  ;;  %v190_v17 = vld [vmem:[%s186_s8 + $0x8] sm:$0xff]  ;;  %v323_v19 = vld [vmem:[#allocation2 + $0xf0] sm:$0xff]  ;;  %327 = vmatpush.msra.mxu1 %v324_v18  ;;  %s615_s6 = sshll.u32 %s179_s5, 4  ;;  %s520_s16 = scalar_lea.sflag [#allocation4], %s179_s5 }
  0x1d   : > { %212 = vmatpush.msra.mxu0 %v203_v3  ;;  %627 = vmatpush.msra.mxu3 %v203_v3  ;;  %v322_v20 = vld [vmem:[#allocation2 + $0xe8] sm:$0xff]  ;;  %v321_v21 = vld [vmem:[#allocation2 + $0xe0] sm:$0xff]  ;;  %v320_v22 = vld [vmem:[#allocation2 + $0xd8] sm:$0xff]  ;;  %s181_s11 = scalar_lea.vmem [#allocation5], %s615_s6  ;;  %p760_p0 = scmp.ne.s32.totalorder %s758_s20, %s759_s24 }
  0x1e   : > { %328 = vmatpush.msra.mxu1 %v323_v19  ;;  %v694_v23 = vld [vmem:[%s985_s2] ss:$0 sm:$0xff]  ;;  %v319_v24 = vld [vmem:[#allocation2 + $0xd0] sm:$0xff]  ;;  %v318_v25 = vld [vmem:[#allocation2 + $0xc8] sm:$0xff]  ;;  %s532_s17 = sshll.u32 %s181_s11, 4  ;;  %p764_p3 = scmp.lt.s32.totalorder %s758_s20, %s986_s3  ;;  %s533_s17 = int_to_ptr.vmem [resolvable:$true] %s532_s17 }
  0x1f   : > { %213 = vmatpush.msra.mxu0 %v202_v4  ;;  %628 = vmatpush.msra.mxu3 %v202_v4  ;;  %v317_v28 = vld [vmem:[#allocation2 + $0xc0] sm:$0xff]  ;;  %v316_v30 = vld [vmem:[#allocation2 + $0xb8] sm:$0xff]  ;;  %v315_v33 = vld [vmem:[#allocation2 + $0xb0] sm:$0xff]  ;;  %p761_p1 = pnand %p760_p0, %p874_p5  ;;  %p765_p4 = scmp.lt.s32.totalorder %s763_s27, %s759_s24 }
  0x20   : > { %329 = vmatpush.msra.mxu1 %v322_v20  ;;  %v314_v38 = vld [vmem:[#allocation2 + $0xa8] sm:$0xff]  ;;  %v313_v42 = vld [vmem:[#allocation2 + $0xa0] sm:$0xff]  ;;  %v312_v46 = vld [vmem:[#allocation2 + $0x98] sm:$0xff] }
  0x21   : > { %214 = vmatpush.msra.mxu0 %v201_v5  ;;  %629 = vmatpush.msra.mxu3 %v201_v5  ;;  %v311_v51 = vld [vmem:[#allocation2 + $0x90] sm:$0xff]  ;;  %v310_v56 = vld [vmem:[#allocation2 + $0x88] sm:$0xff]  ;;  %v309_v59 = vld [vmem:[#allocation2 + $0x80] sm:$0xff]  ;;  %p762_p2 = pneg %p761_p1  ;;  %p766_p7 = por %p765_p4, %p764_p3 }
  0x22   : > { %330 = vmatpush.msra.mxu1 %v321_v21 }
  0x23   : > { %215 = vmatpush.msra.mxu0 %v200_v6  ;;  %630 = vmatpush.msra.mxu3 %v200_v6  ;;  %p767_p8 = pnand %p766_p7, %p762_p2 }
  0x24   : > { %331 = vmatpush.msra.mxu1 %v320_v22  ;;  %v234_v22 = vld [vmem:[%s985_s2 + $0x1] sm:$0x1] }
  0x25   : > { %216 = vmatpush.msra.mxu0 %v199_v7  ;;  %631 = vmatpush.msra.mxu3 %v199_v7 }
  0x26   : > { %332 = vmatpush.msra.mxu1 %v319_v24 }
  0x27   : > { %217 = vmatpush.msra.mxu0 %v198_v8  ;;  %632 = vmatpush.msra.mxu3 %v198_v8 }
  0x28   : > { %333 = vmatpush.msra.mxu1 %v318_v25 }
  0x29   : > { %218 = vmatpush.msra.mxu0 %v197_v9  ;;  %633 = vmatpush.msra.mxu3 %v197_v9 }
  0x2a   : > { %334 = vmatpush.msra.mxu1 %v317_v28  ;;  %v235_v28 = vld [vmem:[%s985_s2 + $0x2] sm:$0x1] }
  0x2b   : > { %219 = vmatpush.msra.mxu0 %v196_v10  ;;  %634 = vmatpush.msra.mxu3 %v196_v10 }
  0x2c   : > { %335 = vmatpush.msra.mxu1 %v316_v30 }
  0x2d   : > { %220 = vmatpush.msra.mxu0 %v195_v11  ;;  %635 = vmatpush.msra.mxu3 %v195_v11 }
  0x2e   : > { %336 = vmatpush.msra.mxu1 %v315_v33 }
  0x2f   : > { %221 = vmatpush.msra.mxu0 %v194_v12  ;;  %636 = vmatpush.msra.mxu3 %v194_v12 }
  0x30   : > { %337 = vmatpush.msra.mxu1 %v314_v38 }
  0x31   : > { %222 = vmatpush.msra.mxu0 %v193_v13  ;;  %637 = vmatpush.msra.mxu3 %v193_v13 }
  0x32   : > { %338 = vmatpush.msra.mxu1 %v313_v42 }
  0x33   : > { %223 = vmatpush.msra.mxu0 %v192_v14  ;;  %638 = vmatpush.msra.mxu3 %v192_v14 }
  0x34   : > { %339 = vmatpush.msra.mxu1 %v312_v46 }
  0x35   : > { %224 = vmatpush.msra.mxu0 %v191_v15  ;;  %639 = vmatpush.msra.mxu3 %v191_v15 }
  0x36   : > { %225 = vmatmul.f32.vlgmr.msra.gmra.mxu0 %v189_v16  ;;  %228 = vmatmul.f32.vlgmr.msra.gmra.mxu3 %v190_v17 }
  0x37   : > { %340 = vmatpush.msra.mxu1 %v311_v51  ;;  %v438_v51 = vld [vmem:[#allocation2 + $0x158] sm:$0xff] }
  0x39   : > { %341 = vmatpush.msra.mxu1 %v310_v56  ;;  %v435_v56 = vld [vmem:[#allocation2 + $0x140] sm:$0xff] }
  0x3b   : > { %342 = vmatpush.msra.mxu1 %v309_v59  ;;  %v434_v59 = vld [vmem:[#allocation2 + $0x138] sm:$0xff] }
  0xb3   : > { %v226_v26 = vpop.f32.mrf.mxu0 }
  0xb4   : > { %v227_v27 = vadd.f32 %v694_v23, %v226_v26 }
  0xb6   : > { %v901_v29 = vmax.f32 %v227_v27, 0.0 }
  0xb8   : > { %v236_v31 = vrot.slane %v901_v29, 4  ;;  %v248_v32 = vmul.f32 %v901_v29, %v901_v29 }
  0xb9   : > { %v229_v34 = vpop.f32.mrf.mxu3 }
  0xba   : > { %v237_v35 = vadd.f32 %v236_v31, %v901_v29  ;;  %v250_v36 = vrot.slane %v248_v32, 4  ;;  %v230_v37 = vadd.f32 %v694_v23, %v229_v34 }
  0xbc   : > { %v238_v39 = vrot.slane %v237_v35, 2  ;;  %v251_v40 = vadd.f32 %v250_v36, %v248_v32  ;;  %v907_v41 = vmax.f32 %v230_v37, 0.0 }
  0xbe   : > { %v252_v43 = vrot.slane %v251_v40, 2  ;;  %v242_v44 = vrot.slane %v907_v41, 4  ;;  %v249_v45 = vmul.f32 %v907_v41, %v907_v41  ;;  %v239_v47 = vadd.f32 %v238_v39, %v237_v35 }
  0xc0   : > { %v253_v48 = vadd.f32 %v252_v43, %v251_v40  ;;  %v243_v49 = vadd.f32 %v242_v44, %v907_v41  ;;  %v256_v50 = vrot.slane %v249_v45, 4  ;;  %v240_v52 = vrot.slane %v239_v47, 1 }
  0xc2   : > { %v254_v53 = vrot.slane %v253_v48, 1  ;;  %v244_v54 = vrot.slane %v243_v49, 2  ;;  %v257_v55 = vadd.f32 %v256_v50, %v249_v45  ;;  %v241_v57 = vadd.f32 %v240_v52, %v239_v47  ;;  %v442_v47 = vld [vmem:[#allocation2 + $0x178] sm:$0xff]  ;;  %v439_v50 = vld [vmem:[#allocation2 + $0x160] sm:$0xff]  ;;  %v437_v52 = vld [vmem:[#allocation2 + $0x150] sm:$0xff] }
  0xc3   : > { %445 = vmatpush.msra.mxu2 %v442_v47 }
  0xc4   : > { %v258_v58 = vrot.slane %v257_v55, 2  ;;  %v255_v60 = vadd.f32 %v254_v53, %v253_v48  ;;  %v262_v61 = vmul.f32 0.125, %v241_v57  ;;  %v245_v62 = vadd.f32 %v244_v54, %v243_v49  ;;  %v441_v48 = vld [vmem:[#allocation2 + $0x170] sm:$0xff]  ;;  %v440_v49 = vld [vmem:[#allocation2 + $0x168] sm:$0xff] }
  0xc5   : > { %446 = vmatpush.msra.mxu2 %v441_v48 }
  0xc6   : > { %v259_v63 = vadd.f32 %v258_v58, %v257_v55  ;;  %v264_v0 = vmul.f32 0.125, %v255_v60  ;;  %v266_v1 = vmul.f32 %v262_v61, %v262_v61  ;;  %v246_v2 = vrot.slane %v245_v62, 1 }
  0xc7   : > { %447 = vmatpush.msra.mxu2 %v440_v49 }
  0xc8   : > { %v260_v3 = vrot.slane %v259_v63, 1  ;;  %v268_v4 = vsub.f32 %v264_v0, %v266_v1  ;;  %v247_v5 = vadd.f32 %v246_v2, %v245_v62  ;;  %v433_v62 = vld [vmem:[#allocation2 + $0x130] sm:$0xff] }
  0xc9   : > { %448 = vmatpush.msra.mxu2 %v439_v50  ;;  %v352_v50 = vld [vmem:[%s985_s2 + $0x4] sm:$0x1] }
  0xca   : > { %v270_v6 = vmax.f32 %v268_v4, 0.0  ;;  %v261_v7 = vadd.f32 %v260_v3, %v259_v63  ;;  %v263_v8 = vmul.f32 0.125, %v247_v5  ;;  %v432_v3 = vld [vmem:[#allocation2 + $0x128] sm:$0xff] }
  0xcb   : > { %449 = vmatpush.msra.mxu2 %v438_v51 }
  0xcc   : > { %v272_v9 = vadd.f32 1e-05, %v270_v6  ;;  %v265_v10 = vmul.f32 0.125, %v261_v7  ;;  %v267_v11 = vmul.f32 %v263_v8, %v263_v8  ;;  %v431_v6 = vld [vmem:[#allocation2 + $0x120] sm:$0xff] }
  0xcd   : > { %450 = vmatpush.msra.mxu2 %v437_v52 }
  0xce   : > { %697 = vrsqrt.f32 %v272_v9  ;;  %v269_v12 = vsub.f32 %v265_v10, %v267_v11  ;;  %vm280_vm1 = vweird.f32 %v272_v9  ;;  %v430_v11 = vld [vmem:[#allocation2 + $0x118] sm:$0xff] }
  0xd0   : > { %v271_v13 = vmax.f32 %v269_v12, 0.0 }
  0xd2   : > { %v273_v14 = vadd.f32 1e-05, %v271_v13 }
  0xd4   : > { %v698_v15 = vpop.eup %697  ;;  %699 = vrsqrt.f32 %v273_v14  ;;  %vm290_vm4 = vweird.f32 %v273_v14 }
  0xd5   : > { %v275_v16 = vmul.f32 %v698_v15, %v272_v9  ;;  %vm281_vm0 = vweird.f32 %v698_v15 }
  0xd6   : > { %vm282_vm2 = vmor %vm280_vm1, %vm281_vm0 }
  0xd7   : > { %v276_v17 = vmul.f32 %v698_v15, %v275_v16  ;;  %v429_v16 = vld [vmem:[#allocation2 + $0x110] sm:$0xff] }
  0xd9   : > { %v277_v18 = vmul.f32 0.5, %v276_v17 }
  0xda   : > { %v700_v19 = vpop.eup %699 }
  0xdb   : > { %v278_v20 = vsub.f32 1.5, %v277_v18  ;;  %v285_v21 = vmul.f32 %v700_v19, %v273_v14  ;;  %vm291_vm3 = vweird.f32 %v700_v19 }
  0xdc   : > { %vm292_vm5 = vmor %vm290_vm4, %vm291_vm3 }
  0xdd   : > { %v279_v23 = vmul.f32 %v698_v15, %v278_v20  ;;  %v286_v24 = vmul.f32 %v700_v19, %v285_v21  ;;  %v428_v20 = vld [vmem:[#allocation2 + $0x108] sm:$0xff] }
  0xdf   : > { %v283_v25 = vsel %vm282_vm2, %v698_v15, %v279_v23  ;;  %v287_v26 = vmul.f32 0.5, %v286_v24  ;;  %v427_v24 = vld [vmem:[#allocation2 + $0x100] sm:$0xff] }
  0xe0   : > { %v294_v27 = vmul.f32 %v283_v25, %v234_v22 }
  0xe1   : > { %v288_v30 = vsub.f32 1.5, %v287_v26 }
  0xe2   : > { %v296_v31 = vmul.f32 %v294_v27, %v262_v61  ;;  %v300_v32 = vperm.slane %v294_v27, 0 }
  0xe3   : > { %v289_v33 = vmul.f32 %v700_v19, %v288_v30 }
  0xe4   : > { %v298_v34 = vsub.f32 %v235_v28, %v296_v31  ;;  %v302_v36 = vmul.f32 %v300_v32, %v901_v29  ;;  %v695_v29 = vld [vmem:[%s985_s2 + $0x3] ss:$0 sm:$0xff] }
  0xe5   : > { %v293_v35 = vsel %vm292_vm5, %v700_v19, %v289_v33 }
  0xe6   : > { %v304_v37 = vperm.slane %v298_v34, 0  ;;  %v295_v38 = vmul.f32 %v293_v35, %v234_v22 }
  0xe8   : > { %v306_v39 = vadd.f32 %v304_v37, %v302_v36  ;;  %v297_v40 = vmul.f32 %v295_v38, %v263_v8  ;;  %v301_v43 = vperm.slane %v295_v38, 0 }
  0xea   : > { %343 = vmatmul.f32.vlgmr.msra.gmra.mxu1 %v306_v39  ;;  %v299_v42 = vsub.f32 %v235_v28, %v297_v40  ;;  %v303_v45 = vmul.f32 %v301_v43, %v907_v41  ;;  %v436_v41 = vld [vmem:[#allocation2 + $0x148] sm:$0xff] }
  0xeb   : > { %451 = vmatpush.msra.mxu2 %v436_v41  ;;  %v353_v41 = vld [vmem:[%s985_s2 + $0x5] sm:$0x1] }
  0xec   : > { %v305_v44 = vperm.slane %v299_v42, 0 }
  0xed   : > { %452 = vmatpush.msra.mxu2 %v435_v56 }
  0xee   : > { %v307_v46 = vadd.f32 %v305_v44, %v303_v45 }
  0xef   : > { %453 = vmatpush.msra.mxu2 %v434_v59 }
  0xf1   : > { %454 = vmatpush.msra.mxu2 %v433_v62 }
  0xf2   : > { %346 = vmatmul.f32.gmra.mxu1 %v307_v46 }
  0xf3   : > { %455 = vmatpush.msra.mxu2 %v432_v3 }
  0xf5   : > { %456 = vmatpush.msra.mxu2 %v431_v6 }
  0xf7   : > { %457 = vmatpush.msra.mxu2 %v430_v11 }
  0xf9   : > { %458 = vmatpush.msra.mxu2 %v429_v16 }
  0xfb   : > { %459 = vmatpush.msra.mxu2 %v428_v20 }
  0xfd   : > { %460 = vmatpush.msra.mxu2 %v427_v24 }
 0x167   : > { %v344_v53 = vpop.f32.mrf.mxu1 }
 0x168   : > { %v345_v54 = vadd.f32 %v695_v29, %v344_v53 }
 0x16a   : > { %v924_v55 = vmax.f32 %v345_v54, 0.0 }
 0x16c   : > { %v354_v57 = vrot.slane %v924_v55, 4  ;;  %v366_v58 = vmul.f32 %v924_v55, %v924_v55 }
 0x16e   : > { %v355_v60 = vadd.f32 %v354_v57, %v924_v55  ;;  %v368_v61 = vrot.slane %v366_v58, 4 }
 0x16f   : > { %v347_v63 = vpop.f32.mrf.mxu1 }
 0x170   : > { %v356_v0 = vrot.slane %v355_v60, 2  ;;  %v369_v1 = vadd.f32 %v368_v61, %v366_v58  ;;  %v348_v2 = vadd.f32 %v695_v29, %v347_v63 }
 0x172   : > { %v370_v4 = vrot.slane %v369_v1, 2  ;;  %v930_v5 = vmax.f32 %v348_v2, 0.0  ;;  %v357_v7 = vadd.f32 %v356_v0, %v355_v60 }
 0x174   : > { %v371_v8 = vadd.f32 %v370_v4, %v369_v1  ;;  %v360_v9 = vrot.slane %v930_v5, 4  ;;  %v367_v10 = vmul.f32 %v930_v5, %v930_v5  ;;  %v358_v12 = vrot.slane %v357_v7, 1 }
 0x176   : > { %v372_v13 = vrot.slane %v371_v8, 1  ;;  %v361_v14 = vadd.f32 %v360_v9, %v930_v5  ;;  %v374_v15 = vrot.slane %v367_v10, 4  ;;  %v359_v17 = vadd.f32 %v358_v12, %v357_v7 }
 0x178   : > { %v362_v18 = vrot.slane %v361_v14, 2  ;;  %v375_v19 = vadd.f32 %v374_v15, %v367_v10  ;;  %v373_v21 = vadd.f32 %v372_v13, %v371_v8  ;;  %v380_v22 = vmul.f32 0.125, %v359_v17 }
 0x179   : > { %v468_v10 = vlaneseq }
 0x17a   : > { %v376_v23 = vrot.slane %v375_v19, 2  ;;  %v382_v25 = vmul.f32 0.125, %v373_v21  ;;  %v384_v26 = vmul.f32 %v380_v22, %v380_v22  ;;  %v363_v27 = vadd.f32 %v362_v18, %v361_v14 }
 0x17b   : > { %v469_v11 = vand.u32 127, %v468_v10 }
 0x17c   : > { %v377_v28 = vadd.f32 %v376_v23, %v375_v19  ;;  %v386_v30 = vsub.f32 %v382_v25, %v384_v26  ;;  %v364_v31 = vrot.slane %v363_v27, 1 }
 0x17d   : > { %vm470_vm12 = vcmp.lt.s32.totalorder %v469_v11, 8 }
 0x17e   : > { %v378_v32 = vrot.slane %v377_v28, 1  ;;  %v388_v33 = vmax.f32 %v386_v30, 0.0  ;;  %v365_v34 = vadd.f32 %v364_v31, %v363_v27 }
 0x180   : > { %v390_v35 = vadd.f32 1e-05, %v388_v33  ;;  %v379_v36 = vadd.f32 %v378_v32, %v377_v28  ;;  %v381_v37 = vmul.f32 0.125, %v365_v34 }
 0x182   : > { %701 = vrsqrt.f32 %v390_v35  ;;  %v383_v38 = vmul.f32 0.125, %v379_v36  ;;  %v385_v39 = vmul.f32 %v381_v37, %v381_v37  ;;  %vm398_vm7 = vweird.f32 %v390_v35 }
 0x184   : > { %v387_v40 = vsub.f32 %v383_v38, %v385_v39 }
 0x186   : > { %v389_v42 = vmax.f32 %v387_v40, 0.0 }
 0x188   : > { %v702_v43 = vpop.eup %701  ;;  %v391_v44 = vadd.f32 1e-05, %v389_v42 }
 0x189   : > { %v393_v45 = vmul.f32 %v702_v43, %v390_v35  ;;  %vm399_vm6 = vweird.f32 %v702_v43 }
 0x18a   : > { %703 = vrsqrt.f32 %v391_v44  ;;  %vm400_vm8 = vmor %vm398_vm7, %vm399_vm6  ;;  %vm408_vm10 = vweird.f32 %v391_v44 }
 0x18b   : > { %v394_v46 = vmul.f32 %v702_v43, %v393_v45 }
 0x18d   : > { %v395_v47 = vmul.f32 0.5, %v394_v46 }
 0x18f   : > { %v396_v48 = vsub.f32 1.5, %v395_v47 }
 0x190   : > { %v704_v49 = vpop.eup %703 }
 0x191   : > { %v397_v29 = vmul.f32 %v702_v43, %v396_v48  ;;  %v403_v51 = vmul.f32 %v704_v49, %v391_v44  ;;  %vm409_vm9 = vweird.f32 %v704_v49 }
 0x192   : > { %vm410_vm11 = vmor %vm408_vm10, %vm409_vm9 }
 0x193   : > { %v401_v52 = vsel %vm400_vm8, %v702_v43, %v397_v29  ;;  %v404_v53 = vmul.f32 %v704_v49, %v403_v51 }
 0x194   : > { %v412_v54 = vmul.f32 %v401_v52, %v352_v50 }
 0x195   : > { %v405_v56 = vmul.f32 0.5, %v404_v53 }
 0x196   : > { %v414_v57 = vmul.f32 %v412_v54, %v380_v22  ;;  %v418_v58 = vperm.slane %v412_v54, 0 }
 0x197   : > { %v406_v59 = vsub.f32 1.5, %v405_v56 }
 0x198   : > { %v416_v60 = vsub.f32 %v353_v41, %v414_v57  ;;  %v420_v62 = vmul.f32 %v418_v58, %v924_v55  ;;  %v696_v55 = vld [vmem:[%s985_s2 + $0x6] ss:$0 sm:$0xff] }
 0x199   : > { %v407_v61 = vmul.f32 %v704_v49, %v406_v59 }
 0x19a   : > { %v422_v63 = vperm.slane %v416_v60, 0 }
 0x19b   : > { %v411_v0 = vsel %vm410_vm11, %v704_v49, %v407_v61 }
 0x19c   : > { %v424_v1 = vadd.f32 %v422_v63, %v420_v62  ;;  %v413_v2 = vmul.f32 %v411_v0, %v352_v50 }
 0x19e   : > { %461 = vmatmul.f32.vlgmr.msra.gmra.mxu2 %v424_v1  ;;  %v415_v3 = vmul.f32 %v413_v2, %v381_v37  ;;  %v419_v4 = vperm.slane %v413_v2, 0 }
 0x1a0   : > { %v417_v6 = vsub.f32 %v353_v41, %v415_v3  ;;  %v421_v7 = vmul.f32 %v419_v4, %v930_v5 }
 0x1a2   : > { %v423_v8 = vperm.slane %v417_v6, 0 }
 0x1a4   : > { %v425_v9 = vadd.f32 %v423_v8, %v421_v7 }
 0x1a6   : > { %464 = vmatmul.f32.gmra.mxu2 %v425_v9 }
 0x221   : > { %v462_v12 = vpop.f32.mrf.mxu2 }
 0x222   : > { %v463_v13 = vadd.f32 %v696_v55, %v462_v12 }
 0x224   : > { %v471_v14 = vsel %vm470_vm12, %v463_v13, -1e+30 }
 0x225   : > { %473 = vmax.xlane.f32.xlu0 %v471_v14 }
 0x229   : > { %v465_v15 = vpop.f32.mrf.mxu2 }
 0x22a   : > { %v466_v16 = vadd.f32 %v696_v55, %v465_v15 }
 0x22c   : > { %v472_v17 = vsel %vm470_vm12, %v466_v16, -1e+30 }
 0x22d   : > { %475 = vmax.xlane.f32.xlu0 %v472_v17 }
 0x298   : > { %v474_v18 = vpop.xlane.xlu0 %473 }
 0x299   : > { %v477_v5 = vsub.f32 %v471_v14, %v474_v18 }
 0x29b   : > { %v479_v19 = vmul.f32 1.442695, %v477_v5 }
 0x29d   : > { %705 = vpow2.f32 %v479_v19 }
 0x2a0   : > { %v476_v20 = vpop.xlane.xlu0 %475 }
 0x2a1   : > { %v478_v21 = vsub.f32 %v472_v17, %v476_v20 }
 0x2a3   : > { %v706_v22 = vpop.eup %705  ;;  %v481_v23 = vmul.f32 1.442695, %v478_v21 }
 0x2a4   : > { %483 = vadd.xlane.f32.xlu1 %v706_v22 }
 0x2a5   : > { %707 = vpow2.f32 %v481_v23 }
 0x2ab   : > { %v708_v24 = vpop.eup %707 }
 0x2ac   : > { %485 = vadd.xlane.f32.xlu1 %v708_v24 }
 0x317   : > { %v484_v25 = vpop.xlane.xlu1 %483 }
 0x318   : > { %709 = vrcp.f32 %v484_v25  ;;  %v498_v31 = vand.u32 2147483648, %v484_v25  ;;  %v496_v33 = vand.u32 2147483647, %v484_v25  ;;  %vm492_vm14 = vweird.f32 %v484_v25 }
 0x31a   : > { %v499_v36 = vor.u32 1.1754944e-38, %v498_v31  ;;  %vm497_vm0 = vcmp.eq.f32.partialorder %v496_v33, 8.507059e+37 }
 0x31e   : > { %v710_v26 = vpop.eup %709 }
 0x31f   : > { %v488_v27 = vmul.f32 %v710_v26, %v484_v25  ;;  %v486_v28 = vpop.xlane.xlu1 %485  ;;  %vm493_vm13 = vweird.f32 %v710_v26 }
 0x320   : > { %711 = vrcp.f32 %v486_v28  ;;  %vm494_vm15 = vmor %vm492_vm14, %vm493_vm13  ;;  %v512_v43 = vand.u32 2147483648, %v486_v28  ;;  %v510_v45 = vand.u32 2147483647, %v486_v28  ;;  %vm506_vm2 = vweird.f32 %v486_v28 }
 0x321   : > { %v489_v30 = vsub.f32 1.0, %v488_v27 }
 0x322   : > { %v513_v47 = vor.u32 1.1754944e-38, %v512_v43  ;;  %vm511_vm4 = vcmp.eq.f32.partialorder %v510_v45, 8.507059e+37 }
 0x323   : > { %v490_v32 = vmul.f32 %v710_v26, %v489_v30 }
 0x325   : > { %v491_v34 = vadd.f32 %v710_v26, %v490_v32 }
 0x326   : > { %v712_v35 = vpop.eup %711 }
 0x327   : > { %v495_v37 = vsel %vm494_vm15, %v710_v26, %v491_v34  ;;  %v502_v38 = vmul.f32 %v712_v35, %v486_v28  ;;  %vm507_vm1 = vweird.f32 %v712_v35 }
 0x328   : > { %v500_v39 = vsel %vm497_vm0, %v499_v36, %v495_v37  ;;  %vm508_vm3 = vmor %vm506_vm2, %vm507_vm1 }
 0x329   : > { %v515_v40 = vmul.f32 %v706_v22, %v500_v39  ;;  %v503_v42 = vsub.f32 1.0, %v502_v38 }
 0x32b   : > { %v504_v44 = vmul.f32 %v712_v35, %v503_v42  ;;  %517 = vst [vmem:[%s181_s11] sm:$0xff] %v515_v40 }
 0x32d   : > { %v505_v46 = vadd.f32 %v712_v35, %v504_v44 }
 0x32f   : > { %v509_v48 = vsel %vm508_vm3, %v712_v35, %v505_v46 }
 0x330   : > { %v514_v49 = vsel %vm511_vm4, %v513_v47, %v509_v48 }
 0x331   : > { %v516_v50 = vmul.f32 %v708_v24, %v514_v49 }
 0x333   : > { %518 = vst [vmem:[%s181_s11 + $0x8] sm:$0xff] %v516_v50 }
 0x334   : > { %770 = shalt.err (!%p767_p8)
}
 0x335   : > { %s814_s30 = smov 128   ;;  %s815_s4 = smov 8  }
 0x336   : > { %644 = dma.vmem_to_hbm [thread:$0]  (%p874_p5), %s533_s17, 256, %s535_s19, %s520_s16, %s814_s30, %s814_s30, %s815_s4  }
 0x337 PF: > { %p656_p9 = scmp.ge.s32.totalorder %s809_s15, 2  ;;  %s549_s5 = sand.u32 1, %s797_s12  }
 0x338   : > { %s550_s6 = scalar_lea.sflag [#allocation4], %s549_s5 }
 0x339   : > { %p651_p10 = pnand %p656_p9, %p878_p6 }
 0x33b   : > { %p652_p11 = pneg %p651_p10 }
 0x33d   : > { %792 = dma.done.wait (%p652_p11), %s550_s6, 256  }
 0x33e   : > { %794 = vsyncadd (%p652_p11), %s550_s6, 4294967040  ;;  %p14_p12 = scmp.ge.s32.totalorder %s861_s18, 4   ;;  %s989_s12 = smov %s801_s13 }
 0x33f   : > { %s990_s13 = smov %s805_s14  ;;  %s991_s14 = smov %s872_s21 }
 0x340   : > { %s992_s15 = smov %s861_s18  ;;  %16 = sbr.rel (!%p14_p12) target bundleno = 4 (0x4), region = 74 }
 0x345   :  { %556 = vsyncpa [#allocation3], 1 }
 0x346   :  { %558 = vsyncpa [#allocation3 + $0x1], 1 }
 0x347   :  { %559 = vsyncpa [#allocation4], 1 }
 0x348   :  { %561 = vsyncpa [#allocation4 + $0x1], 1 }

</bundles_post_ra>
